<compile_context>
chip_gen: v5e
topology: v5e:2x2
jax: 0.10.0
libtpu: 0.0.40
codegen_flags: <defaults>
</compile_context>

<pallas_src>
import jax
import jax.numpy as jnp
from jax.experimental import pallas as pl
from jax.experimental.pallas import tpu as pltpu

IN_FEATURES = 20
HIDDEN = 128
NUM_ACTIONS = 4
OUT_W = 128                      # lane-dense output slab width


def _round_up(x, m):
    return (x + m - 1) // m * m


def actor_critic_kernel(x_ref, w1_ref, w2_ref, out_ref):
    # x_ref : [TB, 21]   (features 0-19 = state, feature 20 = 1.0 for bias)
    # w1_ref: [21, 256]  (cols 0-127 actor hidden, cols 128-255 critic hidden;
    #                     row 20 = layer-1 biases)
    # w2_ref: [257, 128] (rows 0-255 = fused layer-2 weights, row 256 = bias)
    # out_ref:[TB, 128]  (lanes 0..A-1 = action probs, lane A = value, rest 0)
    x = x_ref[...]

    # fused layer 1 (bias folded via ones column) + ReLU -> [TB, 256]
    h = jnp.dot(x, w1_ref[...], preferred_element_type=jnp.float32)
    h = jnp.maximum(h, 0.0)

    # fused layer 2 + packed bias row -> [TB, 128]
    w2 = w2_ref[0:2 * HIDDEN, :]                   # [256, 128] (aligned slice)
    b2 = w2_ref[2 * HIDDEN:2 * HIDDEN + 1, :]      # [1, 128]   (aligned slice)
    raw = jnp.dot(h, w2, preferred_element_type=jnp.float32) + b2
    # raw: lanes 0..A-1 = actor logits, lane A = critic value, rest = 0

    # lane-masked, numerically stable softmax over lanes 0..NUM_ACTIONS-1
    lane = jax.lax.broadcasted_iota(jnp.int32, raw.shape, 1)
    masked = jnp.where(lane < NUM_ACTIONS, raw, -jnp.inf)
    m = jnp.max(masked, axis=-1, keepdims=True)    # XLU lane-reduce
    e = jnp.exp(masked - m)                        # EUP; 0 on non-action lanes
    s = jnp.sum(e, axis=-1, keepdims=True)         # XLU lane-reduce
    inv = pl.reciprocal(s, approx=True)            # EUP slot (nearly free)
    inv = inv * (2.0 - s * inv)                    # one Newton step -> ~fp32
    probs = e * inv

    # lane-dense store: probs in lanes 0..A-1, value in lane A, zeros elsewhere
    out_ref[...] = jnp.where(lane == NUM_ACTIONS, raw, probs)


def actor_critic_forward(state, w1_packed, w2_packed, *, tile_b=512):
    """state: [B, 20] f32.  Returns (action_probs [B, A], state_value [B, 1])."""
    B = state.shape[0]
    state = state.astype(jnp.float32)

    # augment with a ones column so layer-1 bias rides in the matmul
    x_aug = jnp.concatenate([state, jnp.ones((B, 1), jnp.float32)], axis=1)

    tb = min(tile_b, _round_up(B, 8))              # sublane-aligned batch tile
    b_pad = _round_up(B, tb)
    if b_pad != B:
        x_aug = jnp.pad(x_aug, ((0, b_pad - B), (0, 0)))
    k = x_aug.shape[1]                             # 21

    out = pl.pallas_call(
        actor_critic_kernel,
        out_shape=jax.ShapeDtypeStruct((b_pad, OUT_W), jnp.float32),
        grid_spec=pltpu.PrefetchScalarGridSpec(
            num_scalar_prefetch=0,
            grid=(b_pad // tb,),
            in_specs=[
                pl.BlockSpec((tb, k), lambda i: (i, 0)),
                pl.BlockSpec((k, 2 * HIDDEN), lambda i: (0, 0)),
                pl.BlockSpec((2 * HIDDEN + 1, OUT_W), lambda i: (0, 0)),
            ],
            out_specs=pl.BlockSpec((tb, OUT_W), lambda i: (i, 0)),
        ),
        compiler_params=pltpu.CompilerParams(
            dimension_semantics=("parallel",)),
    )(x_aug, w1_packed, w2_packed)

    probs = out[:B, :NUM_ACTIONS]
    value = out[:B, NUM_ACTIONS:NUM_ACTIONS + 1]
    return probs, value


def init_params(key):
    """PyTorch-default-style uniform init; weights stored as [in, out].
    Returns (packed_w1 [21,256], packed_w2 [257,128], raw_param_dict)."""
    ks = jax.random.split(key, 8)

    def lin(kw, kb, fan_in, fan_out):
        bound = 1.0 / (fan_in ** 0.5)
        w = jax.random.uniform(kw, (fan_in, fan_out), jnp.float32, -bound, bound)
        b = jax.random.uniform(kb, (fan_out,), jnp.float32, -bound, bound)
        return w, b

    w1a, b1a = lin(ks[0], ks[1], IN_FEATURES, HIDDEN)
    w2a, b2a = lin(ks[2], ks[3], HIDDEN, NUM_ACTIONS)
    w1c, b1c = lin(ks[4], ks[5], IN_FEATURES, HIDDEN)
    w2c, b2c = lin(ks[6], ks[7], HIDDEN, 1)

    # ----- pack layer 1: [21, 256], last row is the bias -----
    w1p = jnp.zeros((IN_FEATURES + 1, 2 * HIDDEN), jnp.float32)
    w1p = w1p.at[:IN_FEATURES, :HIDDEN].set(w1a)
    w1p = w1p.at[:IN_FEATURES, HIDDEN:].set(w1c)
    w1p = w1p.at[IN_FEATURES, :HIDDEN].set(b1a)
    w1p = w1p.at[IN_FEATURES, HIDDEN:].set(b1c)

    # ----- pack layer 2: [257, 128], last row is the bias -----
    w2p = jnp.zeros((2 * HIDDEN + 1, OUT_W), jnp.float32)
    w2p = w2p.at[:HIDDEN, :NUM_ACTIONS].set(w2a)
    w2p = w2p.at[HIDDEN:2 * HIDDEN, NUM_ACTIONS:NUM_ACTIONS + 1].set(w2c)
    w2p = w2p.at[2 * HIDDEN, :NUM_ACTIONS].set(b2a)
    w2p = w2p.at[2 * HIDDEN, NUM_ACTIONS].set(b2c[0])

    raw = dict(w1a=w1a, b1a=b1a, w2a=w2a, b2a=b2a,
               w1c=w1c, b1c=b1c, w2c=w2c, b2c=b2c)
    return w1p, w2p, raw


def reference_forward(state, p):
    h_a = jnp.maximum(state @ p["w1a"] + p["b1a"], 0.0)
    logits = h_a @ p["w2a"] + p["b2a"]
    probs = jax.nn.softmax(logits, axis=-1)
    h_c = jnp.maximum(state @ p["w1c"] + p["b1c"], 0.0)
    value = h_c @ p["w2c"] + p["b2c"]
    return probs, value


if __name__ == "__main__":
    key = jax.random.PRNGKey(0)
    k_param, k_state = jax.random.split(key)
    w1_packed, w2_packed, raw_params = init_params(k_param)

    B = 8
    state = jax.random.normal(k_state, (B, IN_FEATURES), jnp.float32)

    probs, value = actor_critic_forward(state, w1_packed, w2_packed)
    jax.block_until_ready((probs, value))

    ref_probs, ref_value = reference_forward(state, raw_params)
    assert probs.shape == (B, NUM_ACTIONS) and value.shape == (B, 1)
    assert jnp.allclose(probs, ref_probs, atol=1e-4, rtol=1e-4)
    assert jnp.allclose(value, ref_value, atol=1e-5, rtol=1e-5)
    assert jnp.allclose(jnp.sum(probs, axis=-1), 1.0, atol=1e-4)

    print("KERNEL_OK")
</pallas_src>

<mosaic_0001>
module attributes {stable_mosaic.version = 11 : i64} {
  func.func @actor_critic_kernel(%arg0: i32, %arg1: memref<8x21xf32, #tpu.memory_space<vmem>>, %arg2: memref<21x256xf32, #tpu.memory_space<vmem>>, %arg3: memref<257x128xf32, #tpu.memory_space<vmem>>, %arg4: memref<8x128xf32, #tpu.memory_space<vmem>>) attributes {dimension_semantics = [#tpu.dimension_semantics<parallel>], iteration_bounds = array<i64: 1>, scalar_prefetch = 0 : i64, scratch_operands = 0 : i64, tpu.core_type = #tpu.core_type<tc>, window_params = [{transform_indices = @transform_0, window_bounds = array<i64: 8, 21>}, {pipeline_mode = #tpu.pipeline_mode<synchronous>, transform_indices = @transform_1, window_bounds = array<i64: 21, 256>}, {pipeline_mode = #tpu.pipeline_mode<synchronous>, transform_indices = @transform_2, window_bounds = array<i64: 257, 128>}, {transform_indices = @transform_3, window_bounds = array<i64: 8, 128>}]} {
    %c0 = arith.constant 0 : index
    %c0_0 = arith.constant 0 : index
    %0 = vector.load %arg1[%c0, %c0_0] : memref<8x21xf32, #tpu.memory_space<vmem>>, vector<8x21xf32>
    %c0_1 = arith.constant 0 : index
    %c0_2 = arith.constant 0 : index
    %1 = vector.load %arg2[%c0_1, %c0_2] : memref<21x256xf32, #tpu.memory_space<vmem>>, vector<21x256xf32>
    %cst = arith.constant dense<0.000000e+00> : vector<8x256xf32>
    %2 = tpu.matmul %0, %1, %cst {dimension_numbers = #tpu.dot_dimension_numbers<[1], [0], [0], [1], [0, 0, 1, 1], [], []>} : vector<8x21xf32>, vector<21x256xf32>, vector<8x256xf32> -> vector<8x256xf32>
    %cst_3 = arith.constant 0.000000e+00 : f32
    %3 = vector.broadcast %cst_3 : f32 to vector<8x256xf32>
    %4 = arith.maximumf %2, %3 : vector<8x256xf32>
    %c0_4 = arith.constant 0 : index
    %c0_5 = arith.constant 0 : index
    %5 = vector.load %arg3[%c0_4, %c0_5] : memref<257x128xf32, #tpu.memory_space<vmem>>, vector<256x128xf32>
    %c256 = arith.constant 256 : index
    %c0_6 = arith.constant 0 : index
    %6 = vector.load %arg3[%c256, %c0_6] : memref<257x128xf32, #tpu.memory_space<vmem>>, vector<1x128xf32>
    %cst_7 = arith.constant dense<0.000000e+00> : vector<8x128xf32>
    %7 = tpu.matmul %4, %5, %cst_7 {dimension_numbers = #tpu.dot_dimension_numbers<[1], [0], [0], [1], [0, 0, 1, 1], [], []>} : vector<8x256xf32>, vector<256x128xf32>, vector<8x128xf32> -> vector<8x128xf32>
    %8 = vector.broadcast %6 : vector<1x128xf32> to vector<8x128xf32>
    %9 = arith.addf %7, %8 : vector<8x128xf32>
    %10 = tpu.iota {dimensions = array<i32: 1>} : vector<8x128xi32>
    %c4_i32 = arith.constant 4 : i32
    %11 = vector.broadcast %c4_i32 : i32 to vector<8x128xi32>
    %12 = arith.cmpi slt, %10, %11 : vector<8x128xi32>
    %cst_8 = arith.constant 0xFF800000 : f32
    %13 = vector.broadcast %cst_8 : f32 to vector<8x128xf32>
    %14 = arith.select %12, %9, %13 : vector<8x128xi1>, vector<8x128xf32>
    %cst_9 = arith.constant dense<0xFF800000> : vector<8xf32>
    %15 = vector.multi_reduction <maximumf>, %14, %cst_9 [1] : vector<8x128xf32> to vector<8xf32>
    %16 = vector.shape_cast %15 : vector<8xf32> to vector<8x1xf32>
    %17 = vector.broadcast %16 : vector<8x1xf32> to vector<8x128xf32>
    %18 = arith.subf %14, %17 : vector<8x128xf32>
    %19 = math.exp %18 : vector<8x128xf32>
    %cst_10 = arith.constant dense<0.000000e+00> : vector<8xf32>
    %20 = vector.multi_reduction <add>, %19, %cst_10 [1] : vector<8x128xf32> to vector<8xf32>
    %21 = vector.shape_cast %20 : vector<8xf32> to vector<8x1xf32>
    %22 = tpu.reciprocal %21 {approx = true} : vector<8x1xf32> -> vector<8x1xf32>
    %23 = arith.mulf %21, %22 : vector<8x1xf32>
    %cst_11 = arith.constant 2.000000e+00 : f32
    %24 = vector.broadcast %cst_11 : f32 to vector<8x1xf32>
    %25 = arith.subf %24, %23 : vector<8x1xf32>
    %26 = arith.mulf %22, %25 : vector<8x1xf32>
    %27 = vector.broadcast %26 : vector<8x1xf32> to vector<8x128xf32>
    %28 = arith.mulf %19, %27 : vector<8x128xf32>
    %c4_i32_12 = arith.constant 4 : i32
    %29 = vector.broadcast %c4_i32_12 : i32 to vector<8x128xi32>
    %30 = arith.cmpi eq, %10, %29 : vector<8x128xi32>
    %31 = arith.select %30, %9, %28 : vector<8x128xi1>, vector<8x128xf32>
    %c0_13 = arith.constant 0 : index
    %c0_14 = arith.constant 0 : index
    %32 = vector.load %arg4[%c0_13, %c0_14] : memref<8x128xf32, #tpu.memory_space<vmem>>, vector<8x128xf32>
    tpu.vector_store %arg4[%c0_13, %c0_14], %31 {strides = array<i32>} : memref<8x128xf32, #tpu.memory_space<vmem>>, vector<8x128xf32>,
    return
  }
  func.func @transform_0(%arg0: i32) -> (i32, i32) {
    %c0_i32 = arith.constant 0 : i32
    %c0_i32_0 = arith.constant 0 : i32
    return %arg0, %c0_i32 : i32, i32
  }
  func.func @transform_1(%arg0: i32) -> (i32, i32) {
    %c0_i32 = arith.constant 0 : i32
    %c0_i32_0 = arith.constant 0 : i32
    %c0_i32_1 = arith.constant 0 : i32
    return %c0_i32, %c0_i32_0 : i32, i32
  }
  func.func @transform_2(%arg0: i32) -> (i32, i32) {
    %c0_i32 = arith.constant 0 : i32
    %c0_i32_0 = arith.constant 0 : i32
    %c0_i32_1 = arith.constant 0 : i32
    return %c0_i32, %c0_i32_0 : i32, i32
  }
  func.func @transform_3(%arg0: i32) -> (i32, i32) {
    %c0_i32 = arith.constant 0 : i32
    %c0_i32_0 = arith.constant 0 : i32
    return %arg0, %c0_i32 : i32, i32
  }
}

</mosaic_0001>

<bundles_post_ra>
// kernel: tpu_custom_call.1
= control target key start
LH: loop header
LB: loop body
LE: loop exit
PB: predicated region body
PF: predicated region fallthrough
CT: control target
= control target key end

     0   :  { %8 = vsyncpa [#allocation3], 0  ;;  %s390_s0 = inlined_call_operand.hbm [shape: f32[8,21], index: 0, kind: input, shape index: {}]   ;;  %s391_s1 = inlined_call_operand.hbm [shape: f32[21,256], index: 1, kind: input, shape index: {}]   ;;  %s392_s2 = inlined_call_operand.hbm [shape: f32[257,128], index: 2, kind: input, shape index: {}]   ;;  %s393_s3 = inlined_call_operand.hbm [shape: f32[8,128], index: 3, kind: output, shape index: {}]  }
   0x1   :  { %9 = vsyncpa [#allocation6], 0  ;;  %s26_s14 = sshll.u32 %s391_s1, 4  ;;  %s27_s14 = int_to_ptr.hbm [resolvable:$true] %s26_s14 }
   0x2   :  { %10 = vsyncpa [#allocation4], 0  ;;  %s350_s15 = smov [#allocation5]   ;;  %s16_s19 = sshll.u32 %s390_s0, 4  ;;  %s17_s19 = int_to_ptr.hbm [resolvable:$true] %s16_s19 }
   0x3   :  { %s28_s16 = sshll.u32 %s350_s15, 4  ;;  %s351_s20 = smov 256   ;;  %s29_s16 = int_to_ptr.vmem [resolvable:$true] %s28_s16 }
   0x4   :  { %s352_s21 = smov 16   ;;  %s353_s22 = smov [#allocation2]  }
   0x5   :  { %34 = dma.hbm_to_vmem [thread:$0]  %s27_s14, 768, %s29_s16, [#allocation6], %s351_s20, %s351_s20, %s352_s21  }
   0x6   :  { %s18_s23 = sshll.u32 %s353_s22, 4  ;;  %s39_s26 = sshll.u32 %s392_s2, 4  ;;  %s19_s23 = int_to_ptr.vmem [resolvable:$true] %s18_s23  ;;  %s40_s26 = int_to_ptr.hbm [resolvable:$true] %s39_s26 }
   0x7   :  { %21 = dma.hbm_to_vmem [thread:$0]  %s17_s19, 128, %s19_s23, [#allocation3]  }
   0x8   :  { %s354_s1 = smov [#allocation7]   ;;  %s355_s28 = smov 128  }
   0x9   :  { %s41_s27 = sshll.u32 %s354_s1, 4  ;;  %s356_s29 = smov 8   ;;  %s42_s27 = int_to_ptr.vmem [resolvable:$true] %s41_s27 }
   0xa   :  { %47 = dma.hbm_to_vmem [thread:$0]  %s40_s26, 4224, %s42_s27, [#allocation6], %s355_s28, %s355_s28, %s356_s29  }
   0xb   :  { %344 = dma.done.wait [#allocation3], 128  }
   0xc   :  { %345 = vsyncadd [#allocation3], 4294967168 }
   0xd   :  { %346 = dma.done.wait [#allocation6], 4992  }
   0xe   :  { %347 = vsyncadd [#allocation6], 4294962304  ;;  %vm71_vm0 = vcmask 1044480   ;;  %v65_v0 = vld [vmem:[#allocation5 + $0x20] sm:$0x1f]  ;;  %v63_v1 = vld [vmem:[#allocation5 + $0x10] sm:$0xff]  ;;  %v194_v43 = vlaneseq }
   0xf   :  { %v66_v2 = vld [vmem:[#allocation5 + $0x28] sm:$0x1f]  ;;  %231 = vmatpush.msk.msra.mxu0 %vm71_vm0, %v65_v0  ;;  %v64_v3 = vld [vmem:[#allocation5 + $0x18] sm:$0xff]  ;;  %v61_v4 = vld [vmem:[#allocation5] sm:$0xff]  ;;  %vm67_vm1 = vcmask 171008   ;;  %s357_s0 = smov [#allocation8]  }
  0x10   :  { %233 = vmatpush.msk.msra.mxu1 %vm71_vm0, %v66_v2  ;;  %v62_v5 = vld [vmem:[#allocation5 + $0x8] sm:$0xff]  ;;  %v60_v7 = vld [vmem:[#allocation2] sm:$0xff]  ;;  %v134_v9 = vld [vmem:[#allocation7 + $0x70] sm:$0xff]  ;;  %v195_v45 = vand.u32 127, %v194_v43  ;;  %s218_s2 = sshll.u32 %s357_s0, 4  ;;  %s220_s5 = sshll.u32 %s393_s3, 4  ;;  %s219_s2 = int_to_ptr.vmem [resolvable:$true] %s218_s2  ;;  %s221_s5 = int_to_ptr.hbm [resolvable:$true] %s220_s5 }
  0x11   :  { %v135_v6 = vld [vmem:[#allocation7 + $0x78] sm:$0xff]  ;;  %92 = vmatpush.msra.mxu0 %v63_v1  ;;  %v150_v10 = vld [vmem:[#allocation7 + $0xf0] sm:$0xff]  ;;  %v133_v11 = vld [vmem:[#allocation7 + $0x68] sm:$0xff] }
  0x12   :  { %112 = vmatpush.msra.mxu1 %v64_v3  ;;  %v151_v8 = vld [vmem:[#allocation7 + $0xf8] sm:$0xff]  ;;  %154 = vmatpush.msra.mxu2 %v135_v6  ;;  %v149_v12 = vld [vmem:[#allocation7 + $0xe8] sm:$0xff]  ;;  %v132_v13 = vld [vmem:[#allocation7 + $0x60] sm:$0xff]  ;;  %vm196_vm2 = vcmp.lt.s32.totalorder %v195_v45, 4  ;;  %vm210_vm3 = vcmp.eq.s32.totalorder %v195_v45, 4 }
  0x13   :  { %174 = vmatpush.msra.mxu3 %v151_v8  ;;  %93 = vmatpush.msra.mxu0 %v61_v4  ;;  %v148_v14 = vld [vmem:[#allocation7 + $0xe0] sm:$0xff]  ;;  %v131_v15 = vld [vmem:[#allocation7 + $0x58] sm:$0xff]  ;;  %v130_v17 = vld [vmem:[#allocation7 + $0x50] sm:$0xff] }
  0x14   :  { %113 = vmatpush.msra.mxu1 %v62_v5  ;;  %232 = vmatmul.msk.f32.vlgmr.msra.gmra.mxu0 %vm67_vm1, %v60_v7  ;;  %v147_v16 = vld [vmem:[#allocation7 + $0xd8] sm:$0xff]  ;;  %v146_v18 = vld [vmem:[#allocation7 + $0xd0] sm:$0xff]  ;;  %v129_v19 = vld [vmem:[#allocation7 + $0x48] sm:$0xff] }
  0x15   :  { %234 = vmatmul.msk.f32.vlgmr.msra.gmra.mxu1 %vm67_vm1, %v60_v7  ;;  %155 = vmatpush.msra.mxu2 %v134_v9  ;;  %v145_v20 = vld [vmem:[#allocation7 + $0xc8] sm:$0xff]  ;;  %v128_v21 = vld [vmem:[#allocation7 + $0x40] sm:$0xff]  ;;  %v127_v23 = vld [vmem:[#allocation7 + $0x38] sm:$0xff] }
  0x16   :  { %175 = vmatpush.msra.mxu3 %v150_v10  ;;  %v144_v22 = vld [vmem:[#allocation7 + $0xc0] sm:$0xff]  ;;  %v143_v24 = vld [vmem:[#allocation7 + $0xb8] sm:$0xff]  ;;  %v126_v25 = vld [vmem:[#allocation7 + $0x30] sm:$0xff] }
  0x17   :  { %156 = vmatpush.msra.mxu2 %v133_v11  ;;  %v142_v26 = vld [vmem:[#allocation7 + $0xb0] sm:$0xff]  ;;  %v125_v27 = vld [vmem:[#allocation7 + $0x28] sm:$0xff]  ;;  %v124_v29 = vld [vmem:[#allocation7 + $0x20] sm:$0xff] }
  0x18   :  { %176 = vmatpush.msra.mxu3 %v149_v12  ;;  %v141_v28 = vld [vmem:[#allocation7 + $0xa8] sm:$0xff]  ;;  %v140_v30 = vld [vmem:[#allocation7 + $0xa0] sm:$0xff]  ;;  %v123_v31 = vld [vmem:[#allocation7 + $0x18] sm:$0xff] }
  0x19   :  { %157 = vmatpush.msra.mxu2 %v132_v13  ;;  %v139_v32 = vld [vmem:[#allocation7 + $0x98] sm:$0xff]  ;;  %v122_v33 = vld [vmem:[#allocation7 + $0x10] sm:$0xff]  ;;  %v121_v34 = vld [vmem:[#allocation7 + $0x8] sm:$0xff] }
  0x1a   :  { %177 = vmatpush.msra.mxu3 %v148_v14  ;;  %v138_v35 = vld [vmem:[#allocation7 + $0x90] sm:$0xff]  ;;  %v120_v36 = vld [vmem:[#allocation7] sm:$0xff]  ;;  %v137_v37 = vld [vmem:[#allocation7 + $0x88] sm:$0xff] }
  0x1b   :  { %158 = vmatpush.msra.mxu2 %v131_v15  ;;  %v136_v38 = vld [vmem:[#allocation7 + $0x80] sm:$0xff] }
  0x1c   :  { %178 = vmatpush.msra.mxu3 %v147_v16  ;;  %v243_v44 = vld [vmem:[#allocation7 + $0x100] ss:$0 sm:$0xff] }
  0x1d   :  { %159 = vmatpush.msra.mxu2 %v130_v17 }
  0x1e   :  { %179 = vmatpush.msra.mxu3 %v146_v18 }
  0x1f   :  { %160 = vmatpush.msra.mxu2 %v129_v19 }
  0x20   :  { %180 = vmatpush.msra.mxu3 %v145_v20 }
  0x21   :  { %161 = vmatpush.msra.mxu2 %v128_v21 }
  0x22   :  { %181 = vmatpush.msra.mxu3 %v144_v22 }
  0x23   :  { %162 = vmatpush.msra.mxu2 %v127_v23 }
  0x24   :  { %182 = vmatpush.msra.mxu3 %v143_v24 }
  0x25   :  { %163 = vmatpush.msra.mxu2 %v126_v25 }
  0x26   :  { %183 = vmatpush.msra.mxu3 %v142_v26 }
  0x27   :  { %164 = vmatpush.msra.mxu2 %v125_v27 }
  0x28   :  { %184 = vmatpush.msra.mxu3 %v141_v28 }
  0x29   :  { %165 = vmatpush.msra.mxu2 %v124_v29 }
  0x2a   :  { %185 = vmatpush.msra.mxu3 %v140_v30 }
  0x2b   :  { %166 = vmatpush.msra.mxu2 %v123_v31 }
  0x2c   :  { %186 = vmatpush.msra.mxu3 %v139_v32 }
  0x2d   :  { %167 = vmatpush.msra.mxu2 %v122_v33 }
  0x2e   :  { %187 = vmatpush.msra.mxu3 %v138_v35 }
  0x2f   :  { %168 = vmatpush.msra.mxu2 %v121_v34 }
  0x30   :  { %188 = vmatpush.msra.mxu3 %v137_v37 }
  0x31   :  { %169 = vmatpush.msra.mxu2 %v120_v36 }
  0x32   :  { %189 = vmatpush.msra.mxu3 %v136_v38 }
  0x91   :  { %v95_v39 = vpop.f32.mrf.mxu0 }
  0x92   :  { %v115_v40 = vpop.f32.mrf.mxu1  ;;  %v118_v41 = vmax.f32 %v95_v39, 0.0 }
  0x93   :  { %v119_v42 = vmax.f32 %v115_v40, 0.0 }
  0x94   :  { %170 = vmatmul.f32.vlgmr.msra.gmra.mxu2 %v118_v41 }
  0x95   :  { %190 = vmatmul.f32.vlgmr.msra.gmra.mxu3 %v119_v42 }
 0x117   :  { %v171_v46 = vpop.f32.mrf.mxu2 }
 0x118   :  { %v191_v47 = vpop.f32.mrf.mxu3  ;;  %v172_v48 = vadd.f32 %v243_v44, %v171_v46 }
 0x11a   :  { %v192_v49 = vadd.f32 %v191_v47, %v172_v48 }
 0x11c   :  { %v197_v50 = vsel %vm196_vm2, %v192_v49, -inf }
 0x11d   :  { %198 = vmax.xlane.f32.xlu0 %v197_v50 }
 0x190   :  { %v199_v51 = vpop.xlane.xlu0 %198 }
 0x191   :  { %v200_v52 = vsub.f32 %v197_v50, %v199_v51 }
 0x193   :  { %v201_v53 = vmul.f32 1.442695, %v200_v52 }
 0x195   :  { %244 = vpow2.f32 %v201_v53 }
 0x19b   :  { %v245_v54 = vpop.eup %244 }
 0x19c   :  { %203 = vadd.xlane.f32.xlu0 %v245_v54 }
 0x20f   :  { %v204_v55 = vpop.xlane.xlu0 %203 }
 0x210   :  { %246 = vrcp.f32 %v204_v55 }
 0x216   :  { %v247_v56 = vpop.eup %246 }
 0x217   :  { %v206_v57 = vmul.f32 %v247_v56, %v204_v55 }
 0x219   :  { %v207_v58 = vsub.f32 2.0, %v206_v57 }
 0x21b   :  { %v208_v59 = vmul.f32 %v247_v56, %v207_v58 }
 0x21d   :  { %v209_v60 = vmul.f32 %v245_v54, %v208_v59 }
 0x21f   :  { %v211_v61 = vsel %vm210_vm3, %v192_v49, %v209_v60 }
 0x220   :  { %212 = vst [vmem:[#allocation8] sm:$0xff] %v211_v61 }
 0x221   :  { %223 = dma.vmem_to_hbm [thread:$0]  %s219_s2, 128, %s221_s5, [#allocation4]  }
 0x222   :  { %348 = dma.done.wait [#allocation4], 128  }
 0x223   :  { %349 = vsyncadd [#allocation4], 4294967168 }
 0x224   :  { %228 = vsyncpa [#allocation3], 1 }
 0x225   :  { %229 = vsyncpa [#allocation6], 1 }
 0x226   :  { %230 = vsyncpa [#allocation4], 1 }

</bundles_post_ra>
